<compile_context>
chip_gen: v6e
topology: v6e:2x2x1
jax: 0.10.0
libtpu: 0.0.40
codegen_flags: <defaults>
</compile_context>

<pallas_src>
import functools

import jax
import jax.numpy as jnp
from jax import lax
from jax.experimental import pallas as pl
from jax.experimental.pallas import tpu as pltpu

ALPHA = 1.5
N_ITER = 50  # module default; ~30 iterations is already f32-converged (pass n_iter=30)


def _p_of(z, alpha):
    """clamp(z, 0) ** (1/(alpha-1)); small integer exponents unrolled to VALU multiplies."""
    zc = jnp.maximum(z, 0.0)
    inv = 1.0 / (alpha - 1.0)
    inv_int = int(round(inv))
    if abs(inv - inv_int) < 1e-12 and 1 <= inv_int <= 4:
        r = zc
        for _ in range(inv_int - 1):
            r = r * zc          # alpha=1.5 -> zc*zc on the VALU, not jnp.power on the EUP
        return r
    return jnp.power(zc, inv)   # generic (non-integer exponent) fallback


def log_tsallis_kernel(x_ref, o_ref, *, alpha, n_iter):
    X = x_ref[...].astype(jnp.float32)                 # (tm, D)
    d = X.shape[-1]
    am1 = alpha - 1.0

    Xs = X * am1
    max_val = jnp.max(Xs, axis=-1, keepdims=True)      # (tm, 1)

    tau_lo0 = max_val - 1.0
    # tau_hi - tau_lo0 == 1 - (1/d)**(alpha-1), a per-tile constant.
    dm0 = jnp.full_like(tau_lo0, 1.0 - (1.0 / d) ** am1)

    # At tau_lo0 the max element contributes exactly 1 to sum(p), so f_lo >= 0 always;
    # the reference's sign test (f_m * f_lo >= 0) reduces to (f_m >= 0).
    def body(_, carry):
        tau_lo, dm, _tau_m = carry                     # all (tm, 1): scalar-only carry
        dm = dm * 0.5
        tau_m = tau_lo + dm
        p_m = _p_of(Xs - tau_m, alpha)
        f_m = jnp.sum(p_m, axis=-1, keepdims=True) - 1.0
        tau_lo = jnp.where(f_m >= 0.0, tau_m, tau_lo)
        return (tau_lo, dm, tau_m)

    _, _, tau_m = lax.fori_loop(0, n_iter, body, (tau_lo0, dm0, tau_lo0))

    # Recompute p at the last probed tau_m (bit-exact with the in-loop value) and fold
    # the normalize+log: log(p / sum) = log(p) - log(sum).  p == 0 -> -inf (torch.log(0)).
    p_m = _p_of(Xs - tau_m, alpha)
    p_sum = jnp.sum(p_m, axis=-1, keepdims=True)
    o_ref[...] = (jnp.log(p_m) - jnp.log(p_sum)).astype(o_ref.dtype)


def log_tsallis_bisect(x, *, alpha=ALPHA, n_iter=N_ITER, tm=None):
    assert x.ndim == 2
    N, D = x.shape

    if tm is None:
        # Large row tiles amortize per-grid-step overhead (~0.35 us). Cap the f32 block
        # at ~4 MiB so double-buffered in+out blocks stay well under the scoped VMEM
        # limit on every generation (incl. v7x's 64 MiB physical VMEM).
        tm = min(512, max(8, (1 << 20) // max(D, 1)))
    tm = min(tm, N)
    if tm < N:
        tm = max(8, (tm // 8) * 8)   # sublane-axis block constraint when not full-extent

    block_bytes = tm * D * 4
    vmem_limit = max(32 * 1024 * 1024, min(64 * 1024 * 1024, 16 * block_bytes))

    kernel = functools.partial(log_tsallis_kernel, alpha=alpha, n_iter=n_iter)
    return pl.pallas_call(
        kernel,
        out_shape=jax.ShapeDtypeStruct((N, D), x.dtype),
        grid_spec=pltpu.PrefetchScalarGridSpec(
            num_scalar_prefetch=0,
            grid=(pl.cdiv(N, tm),),          # any N: partial tail block handled by Pallas
            in_specs=[pl.BlockSpec((tm, D), lambda i: (i, 0))],
            out_specs=pl.BlockSpec((tm, D), lambda i: (i, 0)),
        ),
        compiler_params=pltpu.CompilerParams(
            dimension_semantics=("parallel",),   # rows shard across v7x's two TensorCores
            vmem_limit_bytes=vmem_limit,
        ),
    )(x)


def _reference(x, alpha=ALPHA, n_iter=N_ITER):
    # Plain-JAX mirror of the PyTorch tsallis_bisect + log-normalize (keeps f_lo, pow, divide).
    d = x.shape[1]
    am1 = alpha - 1.0
    Xs = x.astype(jnp.float32) * am1
    max_val = jnp.max(Xs, axis=1, keepdims=True)
    tau_lo = max_val - 1.0
    tau_hi = max_val - (1.0 / d) ** am1
    f_lo = jnp.sum(jnp.maximum(Xs - tau_lo, 0.0) ** (1.0 / am1), axis=1, keepdims=True) - 1.0
    dm = tau_hi - tau_lo
    p_m = jnp.maximum(Xs - tau_lo, 0.0) ** (1.0 / am1)
    for _ in range(n_iter):
        dm = dm * 0.5
        tau_m = tau_lo + dm
        p_m = jnp.maximum(Xs - tau_m, 0.0) ** (1.0 / am1)
        f_m = jnp.sum(p_m, axis=1, keepdims=True) - 1.0
        tau_lo = jnp.where((f_m * f_lo) >= 0.0, tau_m, tau_lo)
    p_star = p_m / jnp.sum(p_m, axis=1, keepdims=True)
    return jnp.log(p_star)


def _check(log_p, log_p_ref, atol=1e-4):
    p, p_ref = jnp.exp(log_p), jnp.exp(log_p_ref)      # -inf -> 0, well-conditioned compare
    assert bool(jnp.allclose(p, p_ref, atol=atol)), "probabilities mismatch"
    assert bool(jnp.allclose(p.sum(axis=1), 1.0, atol=1e-4)), "rows do not sum to 1"
    # off-support entries must be exactly -inf, like torch.log(0)
    assert bool(jnp.all(jnp.where(p == 0.0, jnp.isneginf(log_p), True))), "-inf check failed"


if __name__ == "__main__":
    key = jax.random.PRNGKey(0)

    # Small shape consistent with the module: 16 samples, 128 classes (lane-dense D).
    x = jax.random.normal(key, (16, 128), dtype=jnp.float32)

    out = jax.block_until_ready(log_tsallis_bisect(x))              # spec default n_iter=50
    ref = _reference(x)
    _check(out, ref)

    # Perf-feedback validation: ~30 bisection steps already match the 50-step reference.
    out32 = jax.block_until_ready(log_tsallis_bisect(x, n_iter=32))
    _check(out32, ref)

    # Ragged row count (not a multiple of tm): exercises the cdiv grid / partial tail block.
    x2 = jax.random.normal(jax.random.PRNGKey(1), (40, 128), dtype=jnp.float32)
    out2 = jax.block_until_ready(log_tsallis_bisect(x2, tm=16))
    _check(out2, _reference(x2))

    print("KERNEL_OK")
</pallas_src>

<mosaic_0001>
module attributes {stable_mosaic.version = 11 : i64} {
  func.func @log_tsallis_kernel(%arg0: i32, %arg1: memref<16x128xf32, #tpu.memory_space<vmem>>, %arg2: memref<16x128xf32, #tpu.memory_space<vmem>>) attributes {dimension_semantics = [#tpu.dimension_semantics<parallel>], iteration_bounds = array<i64: 1>, scalar_prefetch = 0 : i64, scratch_operands = 0 : i64, tpu.core_type = #tpu.core_type<tc>, window_params = [{transform_indices = @transform_0, window_bounds = array<i64: 16, 128>}, {transform_indices = @transform_1, window_bounds = array<i64: 16, 128>}]} {
    %c0 = arith.constant 0 : index
    %c0_0 = arith.constant 0 : index
    %0 = vector.load %arg1[%c0, %c0_0] : memref<16x128xf32, #tpu.memory_space<vmem>>, vector<16x128xf32>
    %cst = arith.constant 5.000000e-01 : f32
    %1 = vector.broadcast %cst : f32 to vector<16x128xf32>
    %2 = arith.mulf %0, %1 : vector<16x128xf32>
    %cst_1 = arith.constant dense<0xFF800000> : vector<16xf32>
    %3 = vector.multi_reduction <maximumf>, %2, %cst_1 [1] : vector<16x128xf32> to vector<16xf32>
    %4 = vector.shape_cast %3 : vector<16xf32> to vector<16x1xf32>
    %cst_2 = arith.constant 1.000000e+00 : f32
    %5 = vector.broadcast %cst_2 : f32 to vector<16x1xf32>
    %6 = arith.subf %4, %5 : vector<16x1xf32>
    %cst_3 = arith.constant 0.911611676 : f32
    %7 = vector.broadcast %cst_3 : f32 to vector<16x1xf32>
    %c0_i32 = arith.constant 0 : i32
    %c50_i32 = arith.constant 50 : i32
    %8 = arith.addi %c0_i32, %c50_i32 : i32
    %c1_i32 = arith.constant 1 : i32
    %9:3 = scf.for %arg3 = %c0_i32 to %8 step %c1_i32 iter_args(%arg4 = %6, %arg5 = %7, %arg6 = %6) -> (vector<16x1xf32>, vector<16x1xf32>, vector<16x1xf32>)  : i32 {
      %cst_8 = arith.constant 5.000000e-01 : f32
      %22 = vector.broadcast %cst_8 : f32 to vector<16x1xf32>
      %23 = arith.mulf %arg5, %22 : vector<16x1xf32>
      %24 = arith.addf %arg4, %23 : vector<16x1xf32>
      %25 = vector.broadcast %24 : vector<16x1xf32> to vector<16x128xf32>
      %26 = arith.subf %2, %25 : vector<16x128xf32>
      %cst_9 = arith.constant 0.000000e+00 : f32
      %27 = vector.broadcast %cst_9 : f32 to vector<16x128xf32>
      %28 = arith.maximumf %26, %27 : vector<16x128xf32>
      %29 = arith.mulf %28, %28 : vector<16x128xf32>
      %cst_10 = arith.constant dense<0.000000e+00> : vector<16xf32>
      %30 = vector.multi_reduction <add>, %29, %cst_10 [1] : vector<16x128xf32> to vector<16xf32>
      %31 = vector.shape_cast %30 : vector<16xf32> to vector<16x1xf32>
      %cst_11 = arith.constant 1.000000e+00 : f32
      %32 = vector.broadcast %cst_11 : f32 to vector<16x1xf32>
      %33 = arith.subf %31, %32 : vector<16x1xf32>
      %cst_12 = arith.constant 0.000000e+00 : f32
      %34 = vector.broadcast %cst_12 : f32 to vector<16x1xf32>
      %35 = arith.cmpf oge, %33, %34 : vector<16x1xf32>
      %36 = arith.select %35, %24, %arg4 : vector<16x1xi1>, vector<16x1xf32>
      scf.yield %36, %23, %24 : vector<16x1xf32>, vector<16x1xf32>, vector<16x1xf32>
    }
    %10 = vector.broadcast %9#2 : vector<16x1xf32> to vector<16x128xf32>
    %11 = arith.subf %2, %10 : vector<16x128xf32>
    %cst_4 = arith.constant 0.000000e+00 : f32
    %12 = vector.broadcast %cst_4 : f32 to vector<16x128xf32>
    %13 = arith.maximumf %11, %12 : vector<16x128xf32>
    %14 = arith.mulf %13, %13 : vector<16x128xf32>
    %cst_5 = arith.constant dense<0.000000e+00> : vector<16xf32>
    %15 = vector.multi_reduction <add>, %14, %cst_5 [1] : vector<16x128xf32> to vector<16xf32>
    %16 = vector.shape_cast %15 : vector<16xf32> to vector<16x1xf32>
    %17 = math.log %14 : vector<16x128xf32>
    %18 = math.log %16 : vector<16x1xf32>
    %19 = vector.broadcast %18 : vector<16x1xf32> to vector<16x128xf32>
    %20 = arith.subf %17, %19 : vector<16x128xf32>
    %c0_6 = arith.constant 0 : index
    %c0_7 = arith.constant 0 : index
    %21 = vector.load %arg2[%c0_6, %c0_7] : memref<16x128xf32, #tpu.memory_space<vmem>>, vector<16x128xf32>
    tpu.vector_store %arg2[%c0_6, %c0_7], %20 {strides = array<i32>} : memref<16x128xf32, #tpu.memory_space<vmem>>, vector<16x128xf32>,
    return
  }
  func.func @transform_0(%arg0: i32) -> (i32, i32) {
    %c0_i32 = arith.constant 0 : i32
    %c0_i32_0 = arith.constant 0 : i32
    return %arg0, %c0_i32 : i32, i32
  }
  func.func @transform_1(%arg0: i32) -> (i32, i32) {
    %c0_i32 = arith.constant 0 : i32
    %c0_i32_0 = arith.constant 0 : i32
    return %arg0, %c0_i32 : i32, i32
  }
}

</mosaic_0001>

<bundles_post_ra>
// kernel: tpu_custom_call.1
= control target key start
LH: loop header
LB: loop body
LE: loop exit
PB: predicated region body
PF: predicated region fallthrough
CT: control target
= control target key end

     0   :  { %6 = vsyncpa [#allocation3], 0  ;;  %s277_s0 = inlined_call_operand.hbm [shape: f32[16,128], index: 0, kind: input, shape index: {}]   ;;  %s278_s1 = inlined_call_operand.hbm [shape: f32[16,128], index: 1, kind: output, shape index: {}]  }
   0x1   :  { %7 = vsyncpa [#allocation4], 0  ;;  %s246_s6 = smov [#allocation2]  }
   0x2   :  { %s13_s7 = sshll.u32 %s246_s6, 4  ;;  %s14_s7 = int_to_ptr.vmem [resolvable:$true] %s13_s7 }
   0x3   :  { %s178_s8 = scalar_lea.vmem %s14_s7, 256  ;;  %p183_p1 = scmp.lt.s32.totalorder %s14_s7, %s14_s7 }
   0x4   :  { %p179_p0 = scmp.ne.s32.totalorder %s14_s7, %s178_s8  ;;  %p184_p2 = scmp.lt.s32.totalorder %s178_s8, %s178_s8 }
   0x6   :  { %p185_p3 = por %p184_p2, %p183_p1 }
   0x8   :  { %p186_p4 = pnand %p185_p3, %p179_p0 }
   0xa   :  { %189 = shalt.err (!%p186_p4)
}
   0xb   :  { %s247_s9 = smov 128   ;;  %s248_s10 = smov 8  }
   0xc   :  { %19 = dma.hbm_to_vmem [thread:$0]  %s277_s0, 256, %s14_s7, [#allocation3], %s247_s9, %s247_s9, %s248_s10  }
   0xd   :  { %226 = dma.done.wait [#allocation3], 256  }
   0xe   :  { %227 = vsyncadd [#allocation3], 4294967040  ;;  %v23_v0 = vld [vmem:[#allocation2] sm:$0xff]  ;;  %v24_v1 = vld [vmem:[#allocation2 + $0x8] sm:$0xff]  ;;  %v230_v8 = vmov 0.9116117  }
   0xf   :  { %v25_v2 = vmul.f32 0.5, %v23_v0  ;;  %v26_v3 = vmul.f32 0.5, %v24_v1  ;;  %s266_s13 = smov 0  }
  0x11   :  { %27 = vmax.xlane.f32.xlu0 %v25_v2 }
  0x15   :  { %29 = vmax.xlane.f32.xlu0 %v26_v3 }
  0x9a   :  { %v28_v4 = vpop.xlane.xlu0 %27 }
  0x9b   :  { %v122_v5 = vadd.f32 -1.0, %v28_v4  }
  0x9d   :  { %v238_v10 = vmov %v122_v5  }
  0x9e   :  { %v30_v6 = vpop.xlane.xlu0 %29 }
  0x9f   :  { %v123_v7 = vadd.f32 -1.0, %v30_v6  }
  0xa1   :  { %v234_v9 = vmov %v123_v7  }
  0xa2 LB: > { %v44_v8 = vmul.f32 0.5, %v232_v8   ;;  %s38_s13 = sadd.s32 1, %s244_s13   ;;  %s244_s13 = sphi %s266_s13, %s38_s13   ;;  %v240_v10 = vphi %v238_v10, %v61_v10   ;;  %v236_v9 = vphi %v234_v9, %v62_v9   ;;  %v232_v8 = vphi %v230_v8, %v44_v8  }
  0xa3   : > { %p35_p5 = scmp.ge.s32.totalorder %s38_s13, 50  }
  0xa4   : > { %v45_v11 = vadd.f32 %v240_v10, %v44_v8  ;;  %v46_v12 = vadd.f32 %v236_v9, %v44_v8  ;;  %s249_s0 = smov (%p35_p5), [#allocation5]  }
  0xa5   :  { %s90_s14 = sshll.u32 (%p35_p5), %s249_s0, 4  ;;  %s91_s14 = int_to_ptr.vmem [resolvable:$true] %s90_s14 }
  0xa6   : > { %v47_v13 = vsub.f32 %v25_v2, %v45_v11  ;;  %v48_v14 = vsub.f32 %v26_v3, %v46_v12  ;;  %s190_s15 = scalar_lea.vmem (%p35_p5), %s91_s14, 256  ;;  %p195_p7 = scmp.lt.s32.totalorder (%p35_p5), %s91_s14, %s91_s14 }
  0xa7   :  { %p191_p6 = scmp.ne.s32.totalorder (%p35_p5), %s91_s14, %s190_s15  ;;  %p196_p8 = scmp.lt.s32.totalorder (%p35_p5), %s190_s15, %s190_s15 }
  0xa8   : > { %v49_v15 = vmax.f32 %v47_v13, 0.0  ;;  %v50_v16 = vmax.f32 %v48_v14, 0.0 }
  0xa9   :  { %p197_p9 = por (%p35_p5), %p196_p8, %p195_p7 }
  0xaa   : > { %v51_v17 = vmul.f32 %v49_v15, %v49_v15  ;;  %v52_v18 = vmul.f32 %v50_v16, %v50_v16 }
  0xab   :  { %p198_p10 = pnand (%p35_p5), %p197_p9, %p191_p6 }
  0xac   : > { %53 = vadd.xlane.f32.xlu0 %v51_v17  ;;  %162 = vlog2.f32 (%p35_p5), %v51_v17 }
  0xad   :  { %164 = vlog2.f32 (%p35_p5), %v52_v18 }
  0xb0   : > { %55 = vadd.xlane.f32.xlu0 %v52_v18 }
  0xb4   :  { %69 = vadd.xlane.f32.xlu0 (%p35_p5), %v51_v17 }
  0xb8   :  { %71 = vadd.xlane.f32.xlu0 (%p35_p5), %v52_v18 }
  0xb9   :  { %v163_v25 = vpop.eup (%p35_p5), %162 }
  0xba   :  { %v165_v26 = vpop.eup (%p35_p5), %164  ;;  %v74_v27 = vmul.f32 (%p35_p5), 0.6931472, %v163_v25 }
  0xbb   :  { %v76_v30 = vmul.f32 (%p35_p5), 0.6931472, %v165_v26 }
 0x135   : > { %v54_v19 = vpop.xlane.xlu0 %53 }
 0x136   : > { %v124_v20 = vadd.f32 -1.0, %v54_v19 }
 0x138   : > { %vm59_vm0 = vcmp.ge.f32.partialorder %v124_v20, 0.0 }
 0x139   : > { %v61_v10 = vsel %vm59_vm0, %v45_v11, %v240_v10   ;;  %v56_v21 = vpop.xlane.xlu0 %55  ;;  %37 = sbr.rel (!%p35_p5) target bundleno = 162 (0xa2), region = 35 }
 0x13a   : > { %v125_v22 = vadd.f32 -1.0, %v56_v21 }
 0x13c   : > { %vm60_vm1 = vcmp.ge.f32.partialorder %v125_v22, 0.0 }
 0x13d   : > { %v62_v9 = vsel %vm60_vm1, %v46_v12, %v236_v9   ;;  %v70_v23 = vpop.xlane.xlu0 (%p35_p5), %69 }
 0x13e   :  { %166 = vlog2.f32 %v70_v23 }
 0x141   :  { %v72_v24 = vpop.xlane.xlu0 %71 }
 0x142   :  { %168 = vlog2.f32 %v72_v24 }
 0x14b   :  { %v167_v28 = vpop.eup %166 }
 0x14c   :  { %v78_v29 = vmul.f32 0.6931472, %v167_v28 }
 0x14e   :  { %v81_v31 = vsub.f32 %v74_v27, %v78_v29 }
 0x14f   :  { %v169_v32 = vpop.eup %168 }
 0x150   :  { %v80_v33 = vmul.f32 0.6931472, %v169_v32  ;;  %83 = vst [vmem:[#allocation5] sm:$0xff] %v81_v31 }
 0x152   :  { %v82_v34 = vsub.f32 %v76_v30, %v80_v33 }
 0x154   :  { %84 = vst [vmem:[#allocation5 + $0x8] sm:$0xff] %v82_v34 }
 0x155   :  { %201 = shalt.err (!%p198_p10)
}
 0x156   :  { %96 = dma.vmem_to_hbm [thread:$0]  %s91_s14, 256, %s278_s1, [#allocation4], %s247_s9, %s247_s9, %s248_s10  }
 0x157   :  { %228 = dma.done.wait [#allocation4], 256  }
 0x158   :  { %229 = vsyncadd [#allocation4], 4294967040 }
 0x159   :  { %100 = vsyncpa [#allocation3], 1 }
 0x15a   :  { %101 = vsyncpa [#allocation4], 1 }

</bundles_post_ra>
